<compile_context>
chip_gen: v7x
topology: tpu7x:2x2x1
jax: 0.10.0
libtpu: 0.0.40
codegen_flags: <defaults>
</compile_context>

<pallas_src>
import math

import jax
import jax.numpy as jnp
from jax.experimental import pallas as pl
from jax.experimental.pallas import tpu as pltpu

HIDDEN = 4   # self.hidden_channels
PACK = 16    # packed param width: [w1(4) | b1(4) | w2(4) | b2(1) | zero-pad(3)]


def _self_adaption_kernel(x_ref, p_ref, o_ref):
    # x_ref: (TM_C, TN)   pixels; sublanes = channels, lanes = flattened spatial
    # p_ref: (TM_C, PACK) packed per-channel parameters
    p = p_ref[...]
    w1 = p[:, 0:HIDDEN]
    b1 = p[:, HIDDEN:2 * HIDDEN]
    w2 = p[:, 2 * HIDDEN:3 * HIDDEN]
    b2 = p[:, 3 * HIDDEN:3 * HIDDEN + 1]

    x = jnp.maximum(x_ref[...], 0.0)                                  # relu1
    # k = 0 term initializes the accumulator (saves one broadcast per tile).
    h0 = jnp.maximum(w1[:, 0:1] * x + b1[:, 0:1], 0.0)                # convs1+relu3
    acc = w2[:, 0:1] * h0                                             # convs3
    for k in range(1, HIDDEN):                                        # tiny: unroll
        h = jnp.maximum(w1[:, k:k + 1] * x + b1[:, k:k + 1], 0.0)
        acc = acc + w2[:, k:k + 1] * h
    o_ref[...] = (acc + b2).astype(o_ref.dtype)                       # + convs3 bias


def _pick_channel_tile(C):
    # Sublane tile must be a multiple of 8 (and divide C) or equal the full dim.
    for cand in (256, 128, 64, 32, 16, 8):
        if C % cand == 0:
            return cand
    return C  # full-dim block is always legal


def _pick_lane_tile(HW_pad, TM_C):
    # Budget: in + out f32 tiles, each double-buffered, kept under the smallest
    # scoped-VMEM default (v5e: 16 MiB) with headroom; weight table is negligible.
    budget_bytes = 12 * 1024 * 1024
    cap = (budget_bytes // (2 * 2 * 4 * TM_C)) // 128 * 128
    cap = max(128, min(cap, 4096))
    if HW_pad <= cap:
        return HW_pad
    # Prefer a tile that exactly divides HW_pad (no boundary blocks / masking).
    for tn in range(cap, 511, -128):
        if HW_pad % tn == 0:
            return tn
    return cap  # fall back: Pallas handles the partial boundary block


@jax.jit
def self_adaption_forward(x, w1, b1, w2, b2):
    """x: (B, C, H, W) float32 (NCHW, same as PyTorch).
    w1: (4C, 1, 1, 1), b1: (4C,)  -- convs1 params
    w2: (C, 4, 1, 1),  b2: (C,)   -- convs3 params
    Returns (B, C, H, W).
    """
    B, C, H, W = x.shape
    HW = H * W
    # Pad the lane axis to a multiple of 128 so stores are unmasked vst.
    HW_pad = pl.cdiv(HW, 128) * 128

    TM_C = _pick_channel_tile(C)
    TN = _pick_lane_tile(HW_pad, TM_C)

    x3 = x.reshape(B, C, HW)
    if HW_pad != HW:
        x3 = jnp.pad(x3, ((0, 0), (0, 0), (0, HW_pad - HW)))

    # Single packed per-channel parameter table (NOT replicated over batch).
    params = jnp.concatenate(
        [w1.reshape(C, HIDDEN).astype(x.dtype),
         b1.reshape(C, HIDDEN).astype(x.dtype),
         w2.reshape(C, HIDDEN).astype(x.dtype),
         b2.reshape(C, 1).astype(x.dtype),
         jnp.zeros((C, PACK - 3 * HIDDEN - 1), x.dtype)],
        axis=1)

    grid = (B, pl.cdiv(C, TM_C), pl.cdiv(HW_pad, TN))

    elems = B * C * HW
    cost = pl.CostEstimate(
        flops=22 * elems,
        transcendentals=0,
        bytes_accessed=8 * elems + 4 * C * PACK,
    )

    out3 = pl.pallas_call(
        _self_adaption_kernel,
        out_shape=jax.ShapeDtypeStruct((B, C, HW_pad), x.dtype),
        grid=grid,
        in_specs=[
            pl.BlockSpec((None, TM_C, TN), lambda b, i, j: (b, i, j)),
            pl.BlockSpec((TM_C, PACK), lambda b, i, j: (i, 0)),
        ],
        out_specs=pl.BlockSpec((None, TM_C, TN), lambda b, i, j: (b, i, j)),
        compiler_params=pltpu.CompilerParams(
            dimension_semantics=("parallel", "parallel", "parallel")),
        cost_estimate=cost,
    )(x3, params)

    if HW_pad != HW:
        out3 = out3[:, :, :HW]
    return out3.reshape(B, C, H, W)


def _reference(x, w1, b1, w2, b2):
    """Pure-JAX reference of the PyTorch forward (grouped 1x1 convs)."""
    B, C, H, W = x.shape
    xr = jnp.maximum(x, 0.0)                               # relu1
    w1_ck = w1.reshape(C, HIDDEN)
    b1_ck = b1.reshape(C, HIDDEN)
    h = xr[:, :, None, :, :] * w1_ck[None, :, :, None, None] \
        + b1_ck[None, :, :, None, None]
    h = jnp.maximum(h, 0.0)                                # relu3
    w2_ck = w2.reshape(C, HIDDEN)
    y = jnp.sum(h * w2_ck[None, :, :, None, None], axis=2) \
        + b2[None, :, None, None]
    return y


if __name__ == "__main__":
    key = jax.random.PRNGKey(0)
    B, C, H, W = 2, 4, 16, 16
    k_x, k_w1, k_b1, k_w2, k_b2 = jax.random.split(key, 5)

    x = jax.random.normal(k_x, (B, C, H, W), dtype=jnp.float32)

    # Deterministic "PyTorch-like" uniform init for the 1x1 grouped convs.
    # convs1: Conv2d(C, 4C, k=1, groups=C) -> weight (4C,1,1,1), fan_in = 1
    bound1 = 1.0
    w1 = jax.random.uniform(k_w1, (HIDDEN * C, 1, 1, 1), jnp.float32,
                            -bound1, bound1)
    b1 = jax.random.uniform(k_b1, (HIDDEN * C,), jnp.float32, -bound1, bound1)
    # convs3: Conv2d(4C, C, k=1, groups=C) -> weight (C,4,1,1), fan_in = 4
    bound2 = 1.0 / math.sqrt(4.0)
    w2 = jax.random.uniform(k_w2, (C, HIDDEN, 1, 1), jnp.float32,
                            -bound2, bound2)
    b2 = jax.random.uniform(k_b2, (C,), jnp.float32, -bound2, bound2)

    y = self_adaption_forward(x, w1, b1, w2, b2)
    y = jax.block_until_ready(y)

    y_ref = _reference(x, w1, b1, w2, b2)
    assert y.shape == (B, C, H, W)
    assert jnp.allclose(y, y_ref, atol=1e-5, rtol=1e-5), "mismatch vs reference"

    print("KERNEL_OK")
</pallas_src>

<mosaic_0001>
module attributes {stable_mosaic.version = 11 : i64} {
  func.func @_self_adaption_kernel(%arg0: i32, %arg1: i32, %arg2: i32, %arg3: memref<1x4x256xf32, #tpu.memory_space<vmem>>, %arg4: memref<4x16xf32, #tpu.memory_space<vmem>>, %arg5: memref<1x4x256xf32, #tpu.memory_space<vmem>>) attributes {dimension_semantics = [#tpu.dimension_semantics<parallel>, #tpu.dimension_semantics<parallel>, #tpu.dimension_semantics<parallel>], iteration_bounds = array<i64: 2, 1, 1>, scalar_prefetch = 0 : i64, scratch_operands = 0 : i64, tpu.core_type = #tpu.core_type<tc>, window_params = [{transform_indices = @transform_0, window_bounds = array<i64: 1, 4, 256>}, {transform_indices = @transform_1, window_bounds = array<i64: 4, 16>}, {transform_indices = @transform_2, window_bounds = array<i64: 1, 4, 256>}]} {
    %c0 = arith.constant 0 : index
    %c0_0 = arith.constant 0 : index
    %0 = vector.load %arg4[%c0, %c0_0] : memref<4x16xf32, #tpu.memory_space<vmem>>, vector<4x16xf32>
    %1 = vector.extract_strided_slice %0 {offsets = [0, 0], sizes = [4, 4], strides = [1, 1]} : vector<4x16xf32> to vector<4x4xf32>
    %2 = vector.extract_strided_slice %0 {offsets = [0, 4], sizes = [4, 4], strides = [1, 1]} : vector<4x16xf32> to vector<4x4xf32>
    %3 = vector.extract_strided_slice %0 {offsets = [0, 8], sizes = [4, 4], strides = [1, 1]} : vector<4x16xf32> to vector<4x4xf32>
    %4 = vector.extract_strided_slice %0 {offsets = [0, 12], sizes = [4, 1], strides = [1, 1]} : vector<4x16xf32> to vector<4x1xf32>
    %c0_1 = arith.constant 0 : index
    %c0_2 = arith.constant 0 : index
    %c0_3 = arith.constant 0 : index
    %5 = vector.load %arg3[%c0_1, %c0_2, %c0_3] : memref<1x4x256xf32, #tpu.memory_space<vmem>>, vector<1x4x256xf32>
    %6 = vector.shape_cast %5 : vector<1x4x256xf32> to vector<4x256xf32>
    %cst = arith.constant 0.000000e+00 : f32
    %7 = vector.broadcast %cst : f32 to vector<4x256xf32>
    %8 = arith.maximumf %6, %7 : vector<4x256xf32>
    %9 = vector.extract_strided_slice %1 {offsets = [0, 0], sizes = [4, 1], strides = [1, 1]} : vector<4x4xf32> to vector<4x1xf32>
    %10 = vector.broadcast %9 : vector<4x1xf32> to vector<4x256xf32>
    %11 = arith.mulf %10, %8 : vector<4x256xf32>
    %12 = vector.extract_strided_slice %2 {offsets = [0, 0], sizes = [4, 1], strides = [1, 1]} : vector<4x4xf32> to vector<4x1xf32>
    %13 = vector.broadcast %12 : vector<4x1xf32> to vector<4x256xf32>
    %14 = arith.addf %11, %13 : vector<4x256xf32>
    %cst_4 = arith.constant 0.000000e+00 : f32
    %15 = vector.broadcast %cst_4 : f32 to vector<4x256xf32>
    %16 = arith.maximumf %14, %15 : vector<4x256xf32>
    %17 = vector.extract_strided_slice %3 {offsets = [0, 0], sizes = [4, 1], strides = [1, 1]} : vector<4x4xf32> to vector<4x1xf32>
    %18 = vector.broadcast %17 : vector<4x1xf32> to vector<4x256xf32>
    %19 = arith.mulf %18, %16 : vector<4x256xf32>
    %20 = vector.extract_strided_slice %1 {offsets = [0, 1], sizes = [4, 1], strides = [1, 1]} : vector<4x4xf32> to vector<4x1xf32>
    %21 = vector.broadcast %20 : vector<4x1xf32> to vector<4x256xf32>
    %22 = arith.mulf %21, %8 : vector<4x256xf32>
    %23 = vector.extract_strided_slice %2 {offsets = [0, 1], sizes = [4, 1], strides = [1, 1]} : vector<4x4xf32> to vector<4x1xf32>
    %24 = vector.broadcast %23 : vector<4x1xf32> to vector<4x256xf32>
    %25 = arith.addf %22, %24 : vector<4x256xf32>
    %cst_5 = arith.constant 0.000000e+00 : f32
    %26 = vector.broadcast %cst_5 : f32 to vector<4x256xf32>
    %27 = arith.maximumf %25, %26 : vector<4x256xf32>
    %28 = vector.extract_strided_slice %3 {offsets = [0, 1], sizes = [4, 1], strides = [1, 1]} : vector<4x4xf32> to vector<4x1xf32>
    %29 = vector.broadcast %28 : vector<4x1xf32> to vector<4x256xf32>
    %30 = arith.mulf %29, %27 : vector<4x256xf32>
    %31 = arith.addf %19, %30 : vector<4x256xf32>
    %32 = vector.extract_strided_slice %1 {offsets = [0, 2], sizes = [4, 1], strides = [1, 1]} : vector<4x4xf32> to vector<4x1xf32>
    %33 = vector.broadcast %32 : vector<4x1xf32> to vector<4x256xf32>
    %34 = arith.mulf %33, %8 : vector<4x256xf32>
    %35 = vector.extract_strided_slice %2 {offsets = [0, 2], sizes = [4, 1], strides = [1, 1]} : vector<4x4xf32> to vector<4x1xf32>
    %36 = vector.broadcast %35 : vector<4x1xf32> to vector<4x256xf32>
    %37 = arith.addf %34, %36 : vector<4x256xf32>
    %cst_6 = arith.constant 0.000000e+00 : f32
    %38 = vector.broadcast %cst_6 : f32 to vector<4x256xf32>
    %39 = arith.maximumf %37, %38 : vector<4x256xf32>
    %40 = vector.extract_strided_slice %3 {offsets = [0, 2], sizes = [4, 1], strides = [1, 1]} : vector<4x4xf32> to vector<4x1xf32>
    %41 = vector.broadcast %40 : vector<4x1xf32> to vector<4x256xf32>
    %42 = arith.mulf %41, %39 : vector<4x256xf32>
    %43 = arith.addf %31, %42 : vector<4x256xf32>
    %44 = vector.extract_strided_slice %1 {offsets = [0, 3], sizes = [4, 1], strides = [1, 1]} : vector<4x4xf32> to vector<4x1xf32>
    %45 = vector.broadcast %44 : vector<4x1xf32> to vector<4x256xf32>
    %46 = arith.mulf %45, %8 : vector<4x256xf32>
    %47 = vector.extract_strided_slice %2 {offsets = [0, 3], sizes = [4, 1], strides = [1, 1]} : vector<4x4xf32> to vector<4x1xf32>
    %48 = vector.broadcast %47 : vector<4x1xf32> to vector<4x256xf32>
    %49 = arith.addf %46, %48 : vector<4x256xf32>
    %cst_7 = arith.constant 0.000000e+00 : f32
    %50 = vector.broadcast %cst_7 : f32 to vector<4x256xf32>
    %51 = arith.maximumf %49, %50 : vector<4x256xf32>
    %52 = vector.extract_strided_slice %3 {offsets = [0, 3], sizes = [4, 1], strides = [1, 1]} : vector<4x4xf32> to vector<4x1xf32>
    %53 = vector.broadcast %52 : vector<4x1xf32> to vector<4x256xf32>
    %54 = arith.mulf %53, %51 : vector<4x256xf32>
    %55 = arith.addf %43, %54 : vector<4x256xf32>
    %56 = vector.broadcast %4 : vector<4x1xf32> to vector<4x256xf32>
    %57 = arith.addf %55, %56 : vector<4x256xf32>
    %c0_8 = arith.constant 0 : index
    %c0_9 = arith.constant 0 : index
    %c0_10 = arith.constant 0 : index
    %58 = vector.load %arg5[%c0_8, %c0_9, %c0_10] : memref<1x4x256xf32, #tpu.memory_space<vmem>>, vector<1x4x256xf32>
    %59 = vector.shape_cast %58 : vector<1x4x256xf32> to vector<4x256xf32>
    %60 = vector.shape_cast %57 : vector<4x256xf32> to vector<1x4x256xf32>
    tpu.vector_store %arg5[%c0_8, %c0_9, %c0_10], %60 {strides = array<i32>} : memref<1x4x256xf32, #tpu.memory_space<vmem>>, vector<1x4x256xf32>,
    return
  }
  func.func @transform_0(%arg0: i32, %arg1: i32, %arg2: i32) -> (i32, i32, i32) {
    %c0_i32 = arith.constant 0 : i32
    return %arg0, %arg1, %arg2 : i32, i32, i32
  }
  func.func @transform_1(%arg0: i32, %arg1: i32, %arg2: i32) -> (i32, i32) {
    %c0_i32 = arith.constant 0 : i32
    %c0_i32_0 = arith.constant 0 : i32
    return %arg1, %c0_i32 : i32, i32
  }
  func.func @transform_2(%arg0: i32, %arg1: i32, %arg2: i32) -> (i32, i32, i32) {
    %c0_i32 = arith.constant 0 : i32
    return %arg0, %arg1, %arg2 : i32, i32, i32
  }
}

</mosaic_0001>

<bundles_post_ra>
// kernel: self_adaption_forward.1
= control target key start
LH: loop header
LB: loop body
LE: loop exit
PB: predicated region body
PF: predicated region fallthrough
CT: control target
= control target key end

     0   :  { %s579_s9 = smov 0   ;;  %s581_s10 = smov 0   ;;  %s626_s0 = inlined_call_operand.vmem [shape: f32[2,4,256], index: 0, kind: input, shape index: {}]   ;;  %s627_s1 = inlined_call_operand.vmem [shape: f32[4,16], index: 1, kind: input, shape index: {}]   ;;  %s628_s2 = inlined_call_operand.vmem [shape: f32[2,4,256], index: 2, kind: output, shape index: {}]  }
   0x1   :  { %s583_s11 = smov 0  }
   0x2 LB: > { %s31_s12 = sadd.s32 1, %s545_s10  ;;  %p467_p0 = scmp.ge.s32.totalorder %s549_s11, 1  ;;  %s549_s11 = sphi %s583_s11, %s12_s11   ;;  %s545_s10 = sphi %s581_s10, %s630_s10   ;;  %s541_s9 = sphi %s579_s9, %s629_s9  }
   0x3   : > { %p33_p1 = scmp.ge.s32.totalorder %s31_s12, 2  ;;  %p157_p2 = scmp.lt.s32.totalorder %s549_s11, 3 }
   0x5   : > { %s632_s12 = smov (%p33_p1, %s31_s12), 0  ;;  %p158_p3 = pnand %p467_p0, %p157_p2 }
   0x6   : > { %v231_v0 = vld [vmem:[%s627_s1] sm:$0xf] (!%p158_p3)  ;;  %v551_v1 = vmov (!%p158_p3), 4   ;;  %v552_v2 = vmov (!%p158_p3), 0   ;;  %v553_v3 = vmov (!%p158_p3), 5   ;;  %v554_v4 = vmov (!%p158_p3), 1  }
   0x7   : > { %161 = sbr.rel (%p158_p3) target bundleno = 177 (0xb1), region = 28  ;;  %515 = vset.pattern.permute.xlu1 (!%p158_p3), %v551_v1  ;;  %513 = vset.pattern.permute.xlu0 (!%p158_p3), %v552_v2  ;;  %v555_v5 = vmov (!%p158_p3), 2   ;;  %v556_v6 = vmov (!%p158_p3), 6   ;;  %v557_v7 = vmov (!%p158_p3), 3   ;;  %v558_v8 = vmov (!%p158_p3), 9   ;;  %p200_p4 = scmp.lt.s32.totalorder (!%p158_p3), %s541_s9, 1 }
   0x8   : > { %245 = vperm.xlu1 (!%p158_p3), %515, %v231_v0   ;;  %236 = vperm.xlu0 (!%p158_p3), %513, %v231_v0   ;;  %v559_v9 = vmov (!%p158_p3), 8   ;;  %v560_v10 = vmov (!%p158_p3), 11   ;;  %v561_v11 = vmov (!%p158_p3), 7   ;;  %v562_v12 = vmov (!%p158_p3), 12  }
   0x9   : > { %v563_v13 = vmov (!%p158_p3), 10  }
   0xc   : > { %516 = vset.pattern.permute.xlu1 (!%p158_p3), %v553_v3  ;;  %514 = vset.pattern.permute.xlu0 (!%p158_p3), %v554_v4 }
   0xd   : > { %265 = vperm.xlu1 (!%p158_p3), %516, %v231_v0   ;;  %259 = vperm.xlu0 (!%p158_p3), %514, %v231_v0  }
   0xe   : > { %s634_s9 = smov (!%p200_p4, %s541_s9), 1 }
   0xf   : > { %s474_s15 = sshll.u32 %s634_s9, 3 }
  0x10   : > { %s211_s18 = scalar_lea.vmem %s626_s0, %s474_s15  ;;  %s229_s21 = scalar_lea.vmem %s628_s2, %s474_s15 }
  0x11   : > { %517 = vset.pattern.permute.xlu1 %v555_v5  ;;  %518 = vset.pattern.permute.xlu0 %v556_v6  ;;  %v232_v16 = vld [vmem:[%s211_s18] sm:$0xff] }
  0x12   : > { %281 = vperm.xlu1 %517, %v231_v0   ;;  %287 = vperm.xlu0 %518, %v231_v0   ;;  %v233_v17 = vmax.f32 %v232_v16, 0.0 }
  0x14   : > { %v240_v20 = vcombine.high %v233_v17, %v233_v17 }
  0x16   : > { %519 = vset.pattern.permute.xlu1 %v557_v7  ;;  %521 = vset.pattern.permute.xlu0 %v558_v8 }
  0x17   : > { %303 = vperm.xlu1 %519, %v231_v0   ;;  %273 = vperm.xlu0 %521, %v231_v0  }
  0x1b   : > { %520 = vset.pattern.permute.xlu1 %v559_v9  ;;  %524 = vset.pattern.permute.xlu0 %v560_v10 }
  0x1c   : > { %253 = vperm.xlu1 %520, %v231_v0   ;;  %317 = vperm.xlu0 %524, %v231_v0  }
  0x20   : > { %522 = vset.pattern.permute.xlu1 %v561_v11  ;;  %526 = vset.pattern.permute.xlu0 %v562_v12 }
  0x21   : > { %309 = vperm.xlu1 %522, %v231_v0  }
  0x25   : > { %523 = vset.pattern.permute.xlu1 %v563_v13 }
  0x26   : > { %295 = vperm.xlu1 %523, %v231_v0  }
  0x2a   : > { %525 = vset.pattern.permute.xlu1 %v562_v12 }
  0x2b   : > { %325 = vperm.xlu1 %525, %v231_v0  }
  0x87   : > { %v246_v14 = vpop.permute.xlu1 %245  ;;  %v237_v18 = vpop.permute.xlu0 %236 }
  0x88   : > { %v242_v23 = vmul.f32 %v237_v18, %v233_v17  ;;  %v243_v24 = vmul.f32 %v240_v20, %v237_v18 }
  0x8a   : > { %v248_v31 = vadd.f32 %v246_v14, %v242_v23  ;;  %v249_v32 = vadd.f32 %v246_v14, %v243_v24 }
  0x8c   : > { %v266_v15 = vpop.permute.xlu1 %265  ;;  %v260_v22 = vpop.permute.xlu0 %259  ;;  %v250_v39 = vmax.f32 %v248_v31, 0.0  ;;  %v251_v40 = vmax.f32 %v249_v32, 0.0 }
  0x8d   : > { %v262_v25 = vmul.f32 %v260_v22, %v233_v17  ;;  %v263_v26 = vmul.f32 %v260_v22, %v240_v20 }
  0x8f   : > { %v268_v33 = vadd.f32 %v266_v15, %v262_v25  ;;  %v269_v34 = vadd.f32 %v266_v15, %v263_v26 }
  0x91   : > { %v282_v19 = vpop.permute.xlu1 %281  ;;  %v288_v29 = vpop.permute.xlu0 %287  ;;  %v270_v45 = vmax.f32 %v268_v33, 0.0  ;;  %v271_v46 = vmax.f32 %v269_v34, 0.0 }
  0x92   : > { %v284_v27 = vmul.f32 %v282_v19, %v233_v17  ;;  %v285_v28 = vmul.f32 %v282_v19, %v240_v20 }
  0x94   : > { %v290_v35 = vadd.f32 %v288_v29, %v284_v27  ;;  %v291_v36 = vadd.f32 %v288_v29, %v285_v28 }
  0x96   : > { %v304_v21 = vpop.permute.xlu1 %303  ;;  %v274_v42 = vpop.permute.xlu0 %273  ;;  %v292_v49 = vmax.f32 %v290_v35, 0.0  ;;  %v293_v50 = vmax.f32 %v291_v36, 0.0 }
  0x97   : > { %v306_v37 = vmul.f32 %v304_v21, %v233_v17  ;;  %v307_v38 = vmul.f32 %v304_v21, %v240_v20  ;;  %v276_v51 = vmul.f32 %v274_v42, %v270_v45  ;;  %v277_v52 = vmul.f32 %v274_v42, %v271_v46 }
  0x9b   : > { %v254_v30 = vpop.permute.xlu1 %253  ;;  %v318_v55 = vpop.permute.xlu0 %317 }
  0x9c   : > { %v256_v47 = vmul.f32 %v254_v30, %v250_v39  ;;  %v257_v48 = vmul.f32 %v254_v30, %v251_v40 }
  0x9e   : > { %v278_v57 = vadd.f32 %v276_v51, %v256_v47  ;;  %v279_v58 = vadd.f32 %v277_v52, %v257_v48 }
  0xa0   : > { %v310_v41 = vpop.permute.xlu1 %309 }
  0xa1   : > { %v312_v43 = vadd.f32 %v310_v41, %v306_v37  ;;  %v313_v44 = vadd.f32 %v310_v41, %v307_v38 }
  0xa3   : > { %v314_v53 = vmax.f32 %v312_v43, 0.0  ;;  %v315_v54 = vmax.f32 %v313_v44, 0.0 }
  0xa5   : > { %v296_v56 = vpop.permute.xlu1 %295  ;;  %v320_v61 = vmul.f32 %v318_v55, %v314_v53  ;;  %v321_v62 = vmul.f32 %v318_v55, %v315_v54 }
  0xa6   : > { %v298_v59 = vmul.f32 %v296_v56, %v292_v49  ;;  %v299_v60 = vmul.f32 %v296_v56, %v293_v50 }
  0xa8   : > { %v300_v63 = vadd.f32 %v298_v59, %v278_v57  ;;  %v301_v0 = vadd.f32 %v299_v60, %v279_v58 }
  0xaa   : > { %v326_v1 = vpop.permute.xlu1 %325  ;;  %v322_v2 = vadd.f32 %v320_v61, %v300_v63  ;;  %v323_v3 = vadd.f32 %v321_v62, %v301_v0 }
  0xac   : > { %v328_v4 = vadd.f32 %v326_v1, %v322_v2  ;;  %v329_v5 = vadd.f32 %v326_v1, %v323_v3 }
  0xae   : > { %v332_v6 = vcombine.low %v328_v4, %v329_v5 }
  0xb0   : > { %334 = vst [vmem:[%s229_s21] sm:$0xff] %v332_v6 }
  0xb1 PF: > { %s12_s11 = sadd.s32 1, %s549_s11   ;;  %s629_s9 = smov %s545_s10 }
  0xb2   : > { %p9_p5 = scmp.ge.s32.totalorder %s12_s11, 4   ;;  %s630_s10 = smov %s632_s12 }
  0xb4   :  { %11 = sbr.rel (!%p9_p5) target bundleno = 2 (0x2), region = 61 }

</bundles_post_ra>
